<compile_context>
chip_gen: v6e
topology: v6e:2x2x1
jax: 0.10.0
libtpu: 0.0.40
codegen_flags: <defaults>
</compile_context>

<pallas_src>
import functools

import jax
import jax.numpy as jnp
from jax.experimental import pallas as pl
from jax.experimental.pallas import tpu as pltpu


def _round_up(x, m):
    return ((x + m - 1) // m) * m


def _cdiv(a, b):
    return (a + b - 1) // b


def _layer_norm_epilogue(x, gamma_ref, beta_ref, eps):
    # BertLayerNorm over the last (hidden) axis, f32 math; gamma folded into the scale.
    mean = jnp.mean(x, axis=-1, keepdims=True)
    xc = x - mean
    var = jnp.mean(xc * xc, axis=-1, keepdims=True)
    scale = jax.lax.rsqrt(var + eps) * gamma_ref[...].astype(jnp.float32)
    return xc * scale + beta_ref[...].astype(jnp.float32)


def _bert_output_fused_kernel(h_ref, res_ref, w_ref, b_ref, gamma_ref, beta_ref,
                              o_ref, *, eps, apply_ln, compute_dtype):
    # Dense (MXU, f32 accumulation); hidden_states cast to compute dtype in-kernel.
    x = jnp.dot(h_ref[...].astype(compute_dtype), w_ref[...],
                preferred_element_type=jnp.float32)
    # Dropout is identity at inference time.
    # TODO(synk): training-mode dropout (hidden_dropout_prob) not implemented.
    x = x + b_ref[...].astype(jnp.float32) + res_ref[...].astype(jnp.float32)
    if apply_ln:
        x = _layer_norm_epilogue(x, gamma_ref, beta_ref, eps)
    o_ref[...] = x.astype(o_ref.dtype)


def _bert_output_ktiled_kernel(h_ref, res_ref, w_ref, b_ref, gamma_ref, beta_ref,
                               o_ref, acc_ref, *, eps, apply_ln, compute_dtype):
    k = pl.program_id(1)

    @pl.when(k == 0)
    def _():
        acc_ref[...] = jnp.zeros_like(acc_ref)

    acc_ref[...] += jnp.dot(h_ref[...].astype(compute_dtype), w_ref[...],
                            preferred_element_type=jnp.float32)

    @pl.when(k == pl.num_programs(1) - 1)
    def _():
        x = acc_ref[...] + b_ref[...].astype(jnp.float32) + res_ref[...].astype(jnp.float32)
        if apply_ln:
            x = _layer_norm_epilogue(x, gamma_ref, beta_ref, eps)
        o_ref[...] = x.astype(o_ref.dtype)


def bert_output(hidden_states, input_tensor, w, b, gamma, beta, *,
                eps=1e-12, ln_type="postln",
                block_m=1024, block_k=512,
                compute_dtype=jnp.bfloat16, out_dtype=None,
                force_ktiled=False):
    """hidden_states: [B, S, I]; input_tensor: [B, S, H]; w: [I, H]; b/gamma/beta: [H]."""
    B, S, I = hidden_states.shape
    H = input_tensor.shape[-1]
    M = B * S
    out_dtype = input_tensor.dtype if out_dtype is None else out_dtype
    apply_ln = (ln_type != "preln")

    # No wrapper-side cast/pad of the big activations (each would be an extra HBM pass).
    h2 = hidden_states.reshape(M, I)
    r2 = input_tensor.reshape(M, H)
    # One-off cast of the small [I, H] weight so it sits in VMEM at compute width.
    w2 = w if w.dtype == compute_dtype else w.astype(compute_dtype)
    b2 = b.reshape(1, H)
    g2 = gamma.reshape(1, H)
    be2 = beta.reshape(1, H)

    hb = jnp.dtype(h2.dtype).itemsize
    cb = jnp.dtype(compute_dtype).itemsize
    rb = jnp.dtype(r2.dtype).itemsize
    ob = jnp.dtype(out_dtype).itemsize
    param_bytes = 3 * 8 * _round_up(H, 128) * 4

    # Per-core VMEM capacity (v7x: 64 MiB, v5e/v6e: 128 MiB); conservative on failure.
    try:
        vmem_cap = int(pltpu.get_tpu_info().vmem_capacity_bytes)
    except Exception:
        vmem_cap = 64 * 1024 * 1024
    vmem_target = min((vmem_cap * 2) // 3, 80 * 1024 * 1024)

    def fused_bytes(bm_):
        return (2 * bm_ * I * hb        # hidden_states tiles (double-buffered)
                + 2 * I * H * cb        # full weight (resident across M blocks)
                + 2 * bm_ * H * rb      # residual tiles
                + 2 * bm_ * H * ob      # output tiles
                + param_bytes)

    def ktiled_bytes(bm_, bk_):
        return (2 * bm_ * bk_ * hb + 2 * bk_ * H * cb
                + 2 * bm_ * H * rb + 2 * bm_ * H * ob
                + bm_ * H * 4 + param_bytes)

    # M tile: as big as fits the VMEM budget, but keep >= 2 blocks so the 'parallel'
    # M axis can be sharded across v7x's two TensorCores (harmless on 1-TC chips).
    bm = _round_up(max(8, min(block_m, _round_up(M, 8))), 8)
    if M > 8:
        bm = min(bm, _round_up(_cdiv(M, 2), 8))
    while bm > 8 and fused_bytes(bm) > vmem_target:
        bm = _round_up(max(8, bm // 2), 8)

    use_fused = (not force_ktiled) and fused_bytes(bm) <= vmem_target
    num_m = _cdiv(M, bm)

    kernel_kwargs = dict(eps=float(eps), apply_ln=apply_ln, compute_dtype=compute_dtype)
    ln_transcendentals = M if apply_ln else 0

    if use_fused:
        budget = fused_bytes(bm)
        vmem_limit = int(min(max(budget * 5 // 4 + (2 << 20), 32 << 20),
                             vmem_cap - (4 << 20)))
        out = pl.pallas_call(
            functools.partial(_bert_output_fused_kernel, **kernel_kwargs),
            out_shape=jax.ShapeDtypeStruct((M, H), out_dtype),
            grid_spec=pltpu.PrefetchScalarGridSpec(
                num_scalar_prefetch=0,
                grid=(num_m,),
                in_specs=[
                    pl.BlockSpec((bm, I), lambda i: (i, 0)),   # hidden_states tile
                    pl.BlockSpec((bm, H), lambda i: (i, 0)),   # residual tile
                    pl.BlockSpec((I, H), lambda i: (0, 0)),    # weight: DMA'd once, stays resident
                    pl.BlockSpec((1, H), lambda i: (0, 0)),    # dense bias
                    pl.BlockSpec((1, H), lambda i: (0, 0)),    # LayerNorm gamma
                    pl.BlockSpec((1, H), lambda i: (0, 0)),    # LayerNorm beta
                ],
                out_specs=pl.BlockSpec((bm, H), lambda i: (i, 0)),
            ),
            compiler_params=pltpu.CompilerParams(
                dimension_semantics=("parallel",),
                vmem_limit_bytes=vmem_limit),
            cost_estimate=pl.CostEstimate(
                flops=2 * M * I * H,
                transcendentals=ln_transcendentals,
                bytes_accessed=(M * I * hb + I * H * cb
                                + M * H * rb + M * H * ob)),
        )(h2, r2, w2, b2, g2, be2)
    else:
        # Fallback: weight too large for VMEM residency -> stream (bk, H) weight tiles
        # along a K reduction axis ('arbitrary', last) with an f32 accumulator.
        bk = min(_round_up(block_k, 128), _round_up(I, 128))
        while bk > 128 and ktiled_bytes(bm, bk) > vmem_target:
            bk = _round_up(max(128, bk // 2), 128)
        K_pad = _round_up(I, bk)
        h2k = jnp.pad(h2, ((0, 0), (0, K_pad - I))) if K_pad != I else h2
        w2k = jnp.pad(w2, ((0, K_pad - I), (0, 0))) if K_pad != I else w2
        num_k = K_pad // bk
        budget = ktiled_bytes(bm, bk)
        vmem_limit = int(min(max(budget * 5 // 4 + (2 << 20), 32 << 20),
                             vmem_cap - (4 << 20)))
        out = pl.pallas_call(
            functools.partial(_bert_output_ktiled_kernel, **kernel_kwargs),
            out_shape=jax.ShapeDtypeStruct((M, H), out_dtype),
            grid_spec=pltpu.PrefetchScalarGridSpec(
                num_scalar_prefetch=0,
                grid=(num_m, num_k),
                in_specs=[
                    pl.BlockSpec((bm, bk), lambda i, k: (i, k)),  # hidden_states K-tile
                    pl.BlockSpec((bm, H), lambda i, k: (i, 0)),   # residual tile
                    pl.BlockSpec((bk, H), lambda i, k: (k, 0)),   # weight K-tile (streamed)
                    pl.BlockSpec((1, H), lambda i, k: (0, 0)),
                    pl.BlockSpec((1, H), lambda i, k: (0, 0)),
                    pl.BlockSpec((1, H), lambda i, k: (0, 0)),
                ],
                out_specs=pl.BlockSpec((bm, H), lambda i, k: (i, 0)),
                scratch_shapes=[pltpu.VMEM((bm, H), jnp.float32)],
            ),
            compiler_params=pltpu.CompilerParams(
                dimension_semantics=("parallel", "arbitrary"),
                vmem_limit_bytes=vmem_limit),
            cost_estimate=pl.CostEstimate(
                flops=2 * M * K_pad * H,
                transcendentals=ln_transcendentals,
                bytes_accessed=(M * K_pad * hb + num_m * K_pad * H * cb
                                + M * H * rb + M * H * ob)),
        )(h2k, r2, w2k, b2, g2, be2)

    return out.reshape(B, S, H)


def _reference(hidden_states, input_tensor, w, b, gamma, beta, *, eps, ln_type):
    y = jnp.einsum("bsi,ih->bsh", hidden_states, w) + b
    x = y + input_tensor
    if ln_type == "preln":
        return x
    mean = jnp.mean(x, axis=-1, keepdims=True)
    var = jnp.mean((x - mean) ** 2, axis=-1, keepdims=True)
    return (x - mean) / jnp.sqrt(var + eps) * gamma + beta


if __name__ == "__main__":
    # Small, deterministic config: intermediate_size=64, hidden_size=32,
    # layer_norm_eps=1e-12, hidden_dropout_prob=0.1 (identity in eval).
    B, S, I, H = 2, 8, 64, 32
    eps = 1e-12

    key = jax.random.PRNGKey(0)
    k1, k2, k3, k4 = jax.random.split(key, 4)

    hidden_states = jax.random.normal(k1, (B, S, I), dtype=jnp.float32)
    input_tensor = jax.random.normal(k2, (B, S, H), dtype=jnp.float32)

    # Deterministic parameter init (synthetic, not a checkpoint load).
    w = jax.random.normal(k3, (I, H), dtype=jnp.float32) * 0.02   # dense weight (I -> H)
    b = jax.random.normal(k4, (H,), dtype=jnp.float32) * 0.02     # dense bias
    gamma = jnp.ones((H,), dtype=jnp.float32)                     # LayerNorm weight
    beta = jnp.zeros((H,), dtype=jnp.float32)                     # LayerNorm bias

    # Exact-semantics path (f32 operands), both ln_type branches — tight tolerance.
    for ln_type in ("postln", "preln"):
        ref = _reference(hidden_states, input_tensor, w, b, gamma, beta,
                         eps=eps, ln_type=ln_type)
        out_f32 = bert_output(hidden_states, input_tensor, w, b, gamma, beta,
                              eps=eps, ln_type=ln_type, compute_dtype=jnp.float32)
        out_f32 = jax.block_until_ready(out_f32)
        assert out_f32.shape == (B, S, H)
        assert jnp.allclose(out_f32, ref, atol=1e-5, rtol=1e-5)

    ref = _reference(hidden_states, input_tensor, w, b, gamma, beta,
                     eps=eps, ln_type="postln")

    # Performance path (bf16 operands, f32 accumulation / LayerNorm) — looser tolerance.
    out_bf16 = bert_output(hidden_states, input_tensor, w, b, gamma, beta,
                           eps=eps, ln_type="postln")
    out_bf16 = jax.block_until_ready(out_bf16)
    assert out_bf16.shape == (B, S, H)
    assert jnp.allclose(out_bf16, ref, atol=3e-2, rtol=3e-2)

    # K-tiled fallback path (used when the weight is too large for VMEM residency).
    out_kt = bert_output(hidden_states, input_tensor, w, b, gamma, beta,
                         eps=eps, ln_type="postln", compute_dtype=jnp.float32,
                         force_ktiled=True)
    out_kt = jax.block_until_ready(out_kt)
    assert out_kt.shape == (B, S, H)
    assert jnp.allclose(out_kt, ref, atol=1e-5, rtol=1e-5)

    print("KERNEL_OK")
</pallas_src>

<mosaic_0001>
module attributes {stable_mosaic.version = 11 : i64} {
  func.func @_bert_output_fused_kernel(%arg0: i32, %arg1: memref<8x64xf32, #tpu.memory_space<vmem>>, %arg2: memref<8x32xf32, #tpu.memory_space<vmem>>, %arg3: memref<64x32xf32, #tpu.memory_space<vmem>>, %arg4: memref<1x32xf32, #tpu.memory_space<vmem>>, %arg5: memref<1x32xf32, #tpu.memory_space<vmem>>, %arg6: memref<1x32xf32, #tpu.memory_space<vmem>>, %arg7: memref<8x32xf32, #tpu.memory_space<vmem>>) attributes {dimension_semantics = [#tpu.dimension_semantics<parallel>], iteration_bounds = array<i64: 2>, scalar_prefetch = 0 : i64, scratch_operands = 0 : i64, tpu.core_type = #tpu.core_type<tc>, window_params = [{transform_indices = @transform_0, window_bounds = array<i64: 8, 64>}, {transform_indices = @transform_1, window_bounds = array<i64: 8, 32>}, {pipeline_mode = #tpu.pipeline_mode<synchronous>, transform_indices = @transform_2, window_bounds = array<i64: 64, 32>}, {pipeline_mode = #tpu.pipeline_mode<synchronous>, transform_indices = @transform_3, window_bounds = array<i64: 1, 32>}, {pipeline_mode = #tpu.pipeline_mode<synchronous>, transform_indices = @transform_4, window_bounds = array<i64: 1, 32>}, {pipeline_mode = #tpu.pipeline_mode<synchronous>, transform_indices = @transform_5, window_bounds = array<i64: 1, 32>}, {transform_indices = @transform_6, window_bounds = array<i64: 8, 32>}]} {
    %c0 = arith.constant 0 : index
    %c0_0 = arith.constant 0 : index
    %0 = vector.load %arg1[%c0, %c0_0] : memref<8x64xf32, #tpu.memory_space<vmem>>, vector<8x64xf32>
    %c0_1 = arith.constant 0 : index
    %c0_2 = arith.constant 0 : index
    %1 = vector.load %arg3[%c0_1, %c0_2] : memref<64x32xf32, #tpu.memory_space<vmem>>, vector<64x32xf32>
    %cst = arith.constant dense<0.000000e+00> : vector<8x32xf32>
    %2 = tpu.matmul %0, %1, %cst {dimension_numbers = #tpu.dot_dimension_numbers<[1], [0], [0], [1], [0, 0, 1, 1], [], []>} : vector<8x64xf32>, vector<64x32xf32>, vector<8x32xf32> -> vector<8x32xf32>
    %c0_3 = arith.constant 0 : index
    %c0_4 = arith.constant 0 : index
    %3 = vector.load %arg4[%c0_3, %c0_4] : memref<1x32xf32, #tpu.memory_space<vmem>>, vector<1x32xf32>
    %4 = vector.broadcast %3 : vector<1x32xf32> to vector<8x32xf32>
    %5 = arith.addf %2, %4 : vector<8x32xf32>
    %c0_5 = arith.constant 0 : index
    %c0_6 = arith.constant 0 : index
    %6 = vector.load %arg2[%c0_5, %c0_6] : memref<8x32xf32, #tpu.memory_space<vmem>>, vector<8x32xf32>
    %7 = arith.addf %5, %6 : vector<8x32xf32>
    %cst_7 = arith.constant dense<0.000000e+00> : vector<8xf32>
    %8 = vector.multi_reduction <add>, %7, %cst_7 [1] : vector<8x32xf32> to vector<8xf32>
    %9 = vector.shape_cast %8 : vector<8xf32> to vector<8x1xf32>
    %cst_8 = arith.constant 3.200000e+01 : f32
    %10 = vector.broadcast %cst_8 : f32 to vector<8x1xf32>
    %11 = arith.divf %9, %10 : vector<8x1xf32>
    %12 = vector.broadcast %11 : vector<8x1xf32> to vector<8x32xf32>
    %13 = arith.subf %7, %12 : vector<8x32xf32>
    %14 = arith.mulf %13, %13 : vector<8x32xf32>
    %cst_9 = arith.constant dense<0.000000e+00> : vector<8xf32>
    %15 = vector.multi_reduction <add>, %14, %cst_9 [1] : vector<8x32xf32> to vector<8xf32>
    %16 = vector.shape_cast %15 : vector<8xf32> to vector<8x1xf32>
    %cst_10 = arith.constant 3.200000e+01 : f32
    %17 = vector.broadcast %cst_10 : f32 to vector<8x1xf32>
    %18 = arith.divf %16, %17 : vector<8x1xf32>
    %cst_11 = arith.constant 9.99999996E-13 : f32
    %19 = vector.broadcast %cst_11 : f32 to vector<8x1xf32>
    %20 = arith.addf %18, %19 : vector<8x1xf32>
    %21 = math.rsqrt %20 : vector<8x1xf32>
    %c0_12 = arith.constant 0 : index
    %c0_13 = arith.constant 0 : index
    %22 = vector.load %arg5[%c0_12, %c0_13] : memref<1x32xf32, #tpu.memory_space<vmem>>, vector<1x32xf32>
    %23 = vector.broadcast %21 : vector<8x1xf32> to vector<8x32xf32>
    %24 = vector.broadcast %22 : vector<1x32xf32> to vector<8x32xf32>
    %25 = arith.mulf %23, %24 : vector<8x32xf32>
    %26 = arith.mulf %13, %25 : vector<8x32xf32>
    %c0_14 = arith.constant 0 : index
    %c0_15 = arith.constant 0 : index
    %27 = vector.load %arg6[%c0_14, %c0_15] : memref<1x32xf32, #tpu.memory_space<vmem>>, vector<1x32xf32>
    %28 = vector.broadcast %27 : vector<1x32xf32> to vector<8x32xf32>
    %29 = arith.addf %26, %28 : vector<8x32xf32>
    %c0_16 = arith.constant 0 : index
    %c0_17 = arith.constant 0 : index
    %30 = vector.load %arg7[%c0_16, %c0_17] : memref<8x32xf32, #tpu.memory_space<vmem>>, vector<8x32xf32>
    tpu.vector_store %arg7[%c0_16, %c0_17], %29 {strides = array<i32>} : memref<8x32xf32, #tpu.memory_space<vmem>>, vector<8x32xf32>,
    return
  }
  func.func @transform_0(%arg0: i32) -> (i32, i32) {
    %c0_i32 = arith.constant 0 : i32
    %c0_i32_0 = arith.constant 0 : i32
    return %arg0, %c0_i32 : i32, i32
  }
  func.func @transform_1(%arg0: i32) -> (i32, i32) {
    %c0_i32 = arith.constant 0 : i32
    %c0_i32_0 = arith.constant 0 : i32
    return %arg0, %c0_i32 : i32, i32
  }
  func.func @transform_2(%arg0: i32) -> (i32, i32) {
    %c0_i32 = arith.constant 0 : i32
    %c0_i32_0 = arith.constant 0 : i32
    %c0_i32_1 = arith.constant 0 : i32
    return %c0_i32, %c0_i32_0 : i32, i32
  }
  func.func @transform_3(%arg0: i32) -> (i32, i32) {
    %c0_i32 = arith.constant 0 : i32
    %c0_i32_0 = arith.constant 0 : i32
    %c0_i32_1 = arith.constant 0 : i32
    return %c0_i32, %c0_i32_0 : i32, i32
  }
  func.func @transform_4(%arg0: i32) -> (i32, i32) {
    %c0_i32 = arith.constant 0 : i32
    %c0_i32_0 = arith.constant 0 : i32
    %c0_i32_1 = arith.constant 0 : i32
    return %c0_i32, %c0_i32_0 : i32, i32
  }
  func.func @transform_5(%arg0: i32) -> (i32, i32) {
    %c0_i32 = arith.constant 0 : i32
    %c0_i32_0 = arith.constant 0 : i32
    %c0_i32_1 = arith.constant 0 : i32
    return %c0_i32, %c0_i32_0 : i32, i32
  }
  func.func @transform_6(%arg0: i32) -> (i32, i32) {
    %c0_i32 = arith.constant 0 : i32
    %c0_i32_0 = arith.constant 0 : i32
    return %arg0, %c0_i32 : i32, i32
  }
}

</mosaic_0001>

<bundles_post_ra>
// kernel: tpu_custom_call.1
= control target key start
LH: loop header
LB: loop body
LE: loop exit
PB: predicated region body
PF: predicated region fallthrough
CT: control target
= control target key end

     0   :  { %11 = vsyncpa [#allocation3], 0  ;;  %s785_s0 = inlined_call_operand.vmem [shape: f32[16,64], index: 0, kind: input, shape index: {}]   ;;  %s786_s1 = inlined_call_operand.vmem [shape: f32[16,32], index: 1, kind: input, shape index: {}]   ;;  %s787_s2 = inlined_call_operand.vmem [shape: f32[64,32], index: 2, kind: input, shape index: {}]   ;;  %s788_s3 = inlined_call_operand.vmem [shape: f32[1,32], index: 3, kind: input, shape index: {}]   ;;  %s789_s4 = inlined_call_operand.vmem [shape: f32[1,32], index: 4, kind: input, shape index: {}]   ;;  %s790_s5 = inlined_call_operand.vmem [shape: f32[1,32], index: 5, kind: input, shape index: {}]   ;;  %s791_s6 = inlined_call_operand.hbm [shape: f32[16,32], index: 6, kind: output, shape index: {}]  }
   0x1   :  { %13 = vsyncpa [#allocation3 + $0x1], 0  ;;  %s659_s21 = smov 0   ;;  %s661_s22 = smov 0  }
   0x2   :  { %s663_s23 = smov 0   ;;  %s665_s24 = smov 0  }
   0x3 LB: > { %s680_s25 = sadd.s32 4294967295, %s619_s24   ;;  %s473_s26 = sadd.s32 4294967294, %s619_s24   ;;  %s619_s24 = sphi %s665_s24, %s797_s24   ;;  %s615_s23 = sphi %s663_s23, %s796_s23   ;;  %s611_s22 = sphi %s661_s22, %s795_s22   ;;  %s607_s21 = sphi %s659_s21, %s794_s21  }
   0x4   : > { %s684_s27 = sadd.s32 1, %s619_s24   ;;  %s162_s28 = sadd.s32 1, %s615_s23 }
   0x5   : > { %s159_s29 = ssub.s32 %s619_s24, %s684_s27  ;;  %p172_p0 = scmp.ne.s32.totalorder %s615_s23, %s611_s22 }
   0x6   : > { %p160_p1 = scmp.eq.s32.totalorder %s159_s29, 0  ;;  %p173_p2 = scmp.eq.s32.totalorder %s680_s25, 1 }
   0x7   : > { %p178_p3 = scmp.ne.s32.totalorder %s611_s22, %s607_s21  ;;  %p179_p4 = scmp.eq.s32.totalorder %s473_s26, 1 }
   0x8   : > { %s695_s30 = scalar_select %p160_p1, %s615_s23, %s162_s28  }
   0x9   : > { %p697_p5 = por %p173_p2, %p172_p0  ;;  %p701_p6 = por %p179_p4, %p178_p3 }
   0xa   : > { %p476_p7 = scmp.ge.s32.totalorder %s619_s24, 1  ;;  %p223_p8 = scmp.lt.s32.totalorder %s619_s24, 3 }
   0xc   : > { %p224_p9 = pnand %p476_p7, %p223_p8 }
   0xd   : > { %p256_p10 = scmp.lt.s32.totalorder (!%p224_p9), %s680_s25, 1  ;;  %s485_s11 = sshll.u32 (!%p224_p9), %s680_s25, 7 }
   0xe   : > { %227 = sbr.rel (%p224_p9) target bundleno = 554 (0x22a), region = 44  ;;  %s400_s16 = scalar_lea.hbm (!%p224_p9), %s791_s6, %s485_s11 }
   0xf   : > { %s623_s19 = smov (!%p224_p9), [#allocation2]  }
  0x10   : > { %s563_s28 = sshll.u32 (!%p224_p9), %s623_s19, 4  ;;  %s564_s28 = int_to_ptr.vmem [resolvable:$false] %s563_s28 }
  0x13   : > { %v272_v0 = vld [vmem:[%s787_s2 + $0x38] sm:$0xff]  ;;  %v621_v1 = vmov 0.0   ;;  %v271_v2 = vld [vmem:[%s787_s2 + $0x30] sm:$0xff]  ;;  %vm622_vm0 = vmmov 0   ;;  %v270_v3 = vld [vmem:[%s787_s2 + $0x28] sm:$0xff]  ;;  %s257_s15 = scalar_select %p256_p10, %s680_s25, 1 }
  0x14   : > { %497 = vmatprep.subr.mxu0 %v621_v1  ;;  %513 = vmatprep.mubr.msk.f32.mxu0 %vm622_vm0, %v621_v1  ;;  %v269_v4 = vld [vmem:[%s787_s2 + $0x20] sm:$0xff]  ;;  %v268_v5 = vld [vmem:[%s787_s2 + $0x18] sm:$0xff]  ;;  %v267_v6 = vld [vmem:[%s787_s2 + $0x10] sm:$0xff]  ;;  %vm280_vm1 = vcmask 523264   ;;  %vm356_vm2 = vcmask 261120   ;;  %s565_s25 = scalar_lea.vmem %s564_s28, 256 }
  0x15   : > { %498 = vmatpush3.msra.mxu0 %v272_v0  ;;  %s478_s20 = sshll.u32 %s257_s15, 3  ;;  %v266_v7 = vld [vmem:[%s787_s2 + $0x8] sm:$0xff]  ;;  %v265_v8 = vld [vmem:[%s787_s2] sm:$0xff] }
  0x16   : > { %499 = vmatprep.subr.mxu0 %v621_v1  ;;  %s259_s12 = scalar_lea.vmem %s785_s0, %s478_s20  ;;  %s263_s17 = scalar_lea.vmem %s786_s1, %s478_s20  ;;  %v480_v10 = vld [vmem:[%s788_s3] ss:$0 sm:$0xff] }
  0x17   : > { %500 = vmatpush3.msra.mxu0 %v271_v2  ;;  %v264_v9 = vld [vmem:[%s259_s12] sm:$0xff]  ;;  %s253_s20 = sand.u32 1, %s611_s22  }
  0x18   : > { %501 = vmatprep.subr.mxu0 %v621_v1  ;;  %v354_v12 = vld [vmem:[%s263_s17] sm:$0xff]  ;;  %s477_s26 = sshll.u32 %s253_s20, 3  ;;  %s389_s17 = scalar_lea.sflag [#allocation3], %s253_s20 }
  0x19   : > { %502 = vmatpush3.msra.mxu0 %v270_v3  ;;  %v482_v25 = vld [vmem:[%s789_s4] ss:$0 sm:$0xff]  ;;  %s255_s12 = scalar_lea.vmem [#allocation2], %s477_s26 }
  0x1a   : > { %503 = vmatprep.subr.mxu0 %v621_v1  ;;  %v483_v28 = vld [vmem:[%s790_s5] ss:$0 sm:$0xff]  ;;  %s402_s13 = sshll.u32 %s255_s12, 4  ;;  %s403_s13 = int_to_ptr.vmem [resolvable:$true] %s402_s13 }
  0x1b   : > { %504 = vmatpush3.msra.mxu0 %v269_v4  ;;  %s559_s18 = scalar_lea.vmem %s403_s13, 128  ;;  %p566_p0 = scmp.lt.s32.totalorder %s403_s13, %s564_s28 }
  0x1c   : > { %505 = vmatprep.subr.mxu0 %v621_v1  ;;  %p560_p11 = scmp.ne.s32.totalorder %s403_s13, %s559_s18  ;;  %p567_p1 = scmp.lt.s32.totalorder %s565_s25, %s559_s18 }
  0x1d   : > { %506 = vmatpush3.msra.mxu0 %v268_v5 }
  0x1e   : > { %507 = vmatprep.subr.mxu0 %v621_v1  ;;  %p561_p12 = pnand %p560_p11, %p697_p5  ;;  %p568_p2 = por %p567_p1, %p566_p0 }
  0x1f   : > { %508 = vmatpush3.msra.mxu0 %v267_v6 }
  0x20   : > { %509 = vmatprep.subr.mxu0 %v621_v1  ;;  %p562_p13 = pneg %p561_p12 }
  0x21   : > { %510 = vmatpush3.msra.mxu0 %v266_v7 }
  0x22   : > { %511 = vmatprep.subr.mxu0 %v621_v1  ;;  %p569_p3 = pnand %p568_p2, %p562_p13 }
  0x23   : > { %512 = vmatpush3.msra.mxu0 %v265_v8 }
  0x24   : > { %514 = vmatmul.mubr.msk.f32.vlgmr.msra.gmra.mxu0 %vm280_vm1, %v264_v9 }
  0xe4   : > { %v350_v11 = vpop.f32.mrf.mxu0 }
  0xe5   : > { %v351_v13 = vadd.f32 %v480_v10, %v350_v11 }
  0xe6   : > { %v515_v14 = vpop.f32.mrf.mxu0 }
  0xe7   : > { %v355_v15 = vadd.f32 %v354_v12, %v351_v13 }
  0xe9   : > { %v357_v16 = vsel %vm356_vm2, %v355_v15, 0.0 }
  0xea   : > { %358 = vadd.xlane.f32.xlu0 %v357_v16 }
 0x173   : > { %v359_v17 = vpop.xlane.xlu0 %358 }
 0x174   : > { %v361_v18 = vmul.f32 0.03125, %v359_v17 }
 0x176   : > { %v362_v19 = vsub.f32 %v355_v15, %v361_v18 }
 0x178   : > { %v363_v20 = vmul.f32 %v362_v19, %v362_v19 }
 0x17a   : > { %v364_v21 = vsel %vm356_vm2, %v363_v20, 0.0 }
 0x17b   : > { %365 = vadd.xlane.f32.xlu0 %v364_v21 }
 0x204   : > { %v366_v22 = vpop.xlane.xlu0 %365 }
 0x205   : > { %v367_v23 = vmul.f32 0.03125, %v366_v22 }
 0x207   : > { %v368_v24 = vadd.f32 1e-12, %v367_v23 }
 0x209   : > { %557 = vrsqrt.f32 %v368_v24 }
 0x216   : > { %v558_v26 = vpop.eup %557 }
 0x217   : > { %v377_v27 = vmul.f32 %v558_v26, %v482_v25 }
 0x219   : > { %v378_v29 = vmul.f32 %v377_v27, %v362_v19 }
 0x21b   : > { %v386_v30 = vadd.f32 %v483_v28, %v378_v29 }
 0x21d   : > { %387 = vst.msk [vmem:[%s255_s12] sm:$0xff] %vm356_vm2, %v386_v30 }
 0x21e   : > { %572 = shalt.err (!%p569_p3)
}
 0x21f   : > { %s573_s26 = scalar_lea.hbm %s400_s16, 128  ;;  %s577_s9 = scalar_lea.hbm %s791_s6, 256 }
 0x220   : > { %p574_p4 = scmp.ne.s32.totalorder %s400_s16, %s573_s26  ;;  %p578_p9 = scmp.lt.s32.totalorder %s400_s16, %s791_s6 }
 0x221   : > { %p579_p10 = scmp.lt.s32.totalorder %s577_s9, %s573_s26 }
 0x222   : > { %p575_p7 = pnand %p574_p4, %p697_p5 }
 0x223   : > { %p580_p11 = por %p579_p10, %p578_p9 }
 0x224   : > { %p576_p8 = pneg %p575_p7 }
 0x226   : > { %p581_p12 = pnand %p580_p11, %p576_p8 }
 0x228   : > { %584 = shalt.err (!%p581_p12)
}
 0x229   : > { %516 = dma.vmem_to_hbm [thread:$0]  (%p697_p5), %s403_s13, 128, %s400_s16, %s389_s17  }
 0x22a PF: > { %p522_p13 = scmp.ge.s32.totalorder %s619_s24, 2  ;;  %s414_s12 = sand.u32 1, %s607_s21  }
 0x22b   : > { %s415_s14 = scalar_lea.sflag [#allocation3], %s414_s12 }
 0x22c   : > { %p519_p0 = pnand %p522_p13, %p701_p6 }
 0x22e   : > { %p520_p1 = pneg %p519_p0 }
 0x230   : > { %602 = dma.done.wait (%p520_p1), %s415_s14, 128  }
 0x231   : > { %604 = vsyncadd (%p520_p1), %s415_s14, 4294967168  ;;  %p16_p2 = scmp.ge.s32.totalorder %s684_s27, 4   ;;  %s794_s21 = smov %s611_s22 }
 0x232   : > { %s795_s22 = smov %s615_s23  ;;  %s796_s23 = smov %s695_s30 }
 0x233   : > { %s797_s24 = smov %s684_s27  ;;  %18 = sbr.rel (!%p16_p2) target bundleno = 3 (0x3), region = 82 }
 0x238   :  { %420 = vsyncpa [#allocation3], 1 }
 0x239   :  { %422 = vsyncpa [#allocation3 + $0x1], 1 }

</bundles_post_ra>
